<compile_context>
chip_gen: v7x
topology: tpu7x:2x2x1
jax: 0.10.0
libtpu: 0.0.40
codegen_flags: <defaults>
</compile_context>

<pallas_src>
import jax
import jax.numpy as jnp
from jax.experimental import pallas as pl
from jax.experimental.pallas import tpu as pltpu


def relation_attention_kernel(
    p_ref,        # (bt, C, H)   hbm_dtype (bf16 by default)
    x_ref,        # (bt, L, H)   hbm_dtype
    maskb_ref,    # (bt, 1, L)   f32 additive: score_bias where valid, -1e9 where masked
    vecs_ref,     # (5, H)       f32: [score-q, score-k, gate-out, gate-p, bv]
    wv_ref,       # (H, H)       hbm_dtype, value weight pre-transposed to (in, out)
    bg_ref,       # (1,)         f32 gate bias, in SMEM
    out_ref,      # (bt, C, H)   output (caller dtype)
):
    bt, C, H = p_ref.shape
    L = x_ref.shape[1]
    f32 = jnp.float32

    x = x_ref[...]                       # keep native (bf16) for the MXU matmul
    p = p_ref[...].astype(f32)           # VPU/EUP work is done in f32
    x32 = x.astype(f32)

    wqs = vecs_ref[0:1, :]               # (1, H) f32
    wks = vecs_ref[1:2, :]
    wgo = vecs_ref[2:3, :]
    wgp = vecs_ref[3:4, :]
    bv = vecs_ref[4:5, :]

    # Rank-1 score projections on the VPU (multiply + lane reduce).
    q_s = jnp.sum(p * wqs, axis=-1)      # (bt, C)
    k_s = jnp.sum(x32 * wks, axis=-1)    # (bt, L)

    # score[b,c,l] = q_s[b,c] + k_s[b,l] + (score_bias | -1e9) folded into maskb.
    score = q_s[:, :, None] + k_s[:, None, :] + maskb_ref[...]   # (bt, C, L) f32

    # Softmax over L; normalization via EUP reciprocal.
    score = score - jnp.max(score, axis=-1, keepdims=True)
    e = jnp.exp(score)
    attn = e * pl.reciprocal(jnp.sum(e, axis=-1, keepdims=True), approx=True)

    # Value projection: one (bt*L, H) x (H, H) bf16 MXU matmul, f32 accumulation.
    v = jnp.dot(x.reshape(bt * L, H), wv_ref[...],
                preferred_element_type=f32)
    v = v.reshape(bt, L, H) + bv                                  # (bt, L, H) f32

    # Context on the VPU: tiny per-batch matmuls (M=C) would badly underuse the
    # MXU, so do broadcast-multiply + sublane reduce over L instead.
    ctx = jnp.sum(attn[:, :, :, None] * v[:, None, :, :], axis=2)  # (bt, C, H)
    out = ctx + p

    # Gate: rank-1 projections fused into a single lane reduce; bias from SMEM.
    g_logit = jnp.sum(out * wgo + p * wgp, axis=-1, keepdims=True) + bg_ref[0]
    g = jax.nn.sigmoid(g_logit)                                    # (bt, C, 1)

    out_ref[...] = (g * out + (1.0 - g) * p).astype(out_ref.dtype)


def _pick_batch_block(B, C, L, H, hbm_itemsize, vmem_tile_budget=24 << 20):
    """Largest divisor of B that (a) keeps >= min(B,4) grid steps so the DMA
    pipeline overlaps and v7x can shard across its two TensorCores, and
    (b) keeps the double-buffered tile + f32 intermediates under a
    conservative, generation-agnostic VMEM budget."""
    if B == 1:
        return 1
    per_row = (2 * hbm_itemsize * (L * H + C * H)       # x, p (double-buffered)
               + 2 * 4 * L                              # additive mask (f32)
               + 4 * (L * H + 2 * C * L + C * L * H + 4 * C * H))  # f32 temps
    bt_budget = max(1, vmem_tile_budget // per_row)
    bt_steps = max(1, B // min(B, 4))
    cap = min(bt_budget, bt_steps)
    bt = 1
    for d in range(1, B + 1):
        if B % d == 0 and d <= cap:
            bt = d
    return bt


def relation_attention(p, x, mask, wq, bq, wk, bk, wv, bv, ws, bs, wg, bg,
                       *, batch_block=None, hbm_dtype=jnp.bfloat16):
    """p: (B,C,H), x: (B,L,H), mask: (B,L) with 1.0 = valid, 0.0 = masked."""
    B, C, H = p.shape
    L = x.shape[1]
    f32 = jnp.float32
    out_dtype = p.dtype

    # --- fold Q/K projections into rank-1 score vectors -------------------
    #   q_s = (p @ Wq^T + bq) @ ws_q = p @ (Wq^T @ ws_q) + bq @ ws_q
    ws_q = ws[0, :H].astype(f32)
    ws_k = ws[0, H:].astype(f32)
    wqs = wq.astype(f32).T @ ws_q                     # (H,)
    wks = wk.astype(f32).T @ ws_k                     # (H,)
    score_bias = bq.astype(f32) @ ws_q + bk.astype(f32) @ ws_k + bs.astype(f32)[0]

    wg_out = wg[0, :H].astype(f32)                    # applied to attention output
    wg_p = wg[0, H:].astype(f32)                      # applied to p
    vecs = jnp.stack([wqs, wks, wg_out, wg_p, bv.astype(f32)], axis=0)   # (5, H)

    # HBM-resident tensors in bf16 (halves DMA traffic; MXU runs bf16 + f32 acc).
    p_h = p.astype(hbm_dtype)
    x_h = x.astype(hbm_dtype)
    wv_t = wv.T.astype(hbm_dtype)                     # (H, H) as (in, out)
    bg_r = bg.astype(f32).reshape(1)                  # scalar -> SMEM

    # Additive mask with the (softmax-invariant) scalar score bias folded in.
    mask_bias = jnp.where(mask.astype(f32) >= 0.5, score_bias, f32(-1.0e9))
    mask_bias = mask_bias.reshape(B, 1, L)

    # --- batch tiling ------------------------------------------------------
    itemsize = jnp.dtype(hbm_dtype).itemsize
    bt = _pick_batch_block(B, C, L, H, itemsize) if batch_block is None else batch_block
    assert B % bt == 0, "batch_block must divide B"
    grid = (B // bt,)

    # Explicit, generation-aware VMEM limit (>= defaults, well under v7x's 64 MiB).
    tile_in = 2 * itemsize * bt * (L * H + C * H) + 2 * 4 * bt * L
    tile_tmp = 4 * bt * (L * H + 2 * C * L + C * L * H + 4 * C * H)
    weights = 4 * (5 * H) + itemsize * H * H
    out_buf = 2 * bt * C * H * jnp.dtype(out_dtype).itemsize
    est = tile_in + tile_tmp + weights + out_buf
    vmem_limit = int(min(48 << 20, max(32 << 20, 2 * est)))

    grid_spec = pltpu.PrefetchScalarGridSpec(
        num_scalar_prefetch=0,
        grid=grid,
        in_specs=[
            pl.BlockSpec((bt, C, H), lambda i: (i, 0, 0)),   # p
            pl.BlockSpec((bt, L, H), lambda i: (i, 0, 0)),   # x
            pl.BlockSpec((bt, 1, L), lambda i: (i, 0, 0)),   # additive mask/bias
            pl.BlockSpec((5, H), lambda i: (0, 0)),          # packed rank-1 vectors + bv
            pl.BlockSpec((H, H), lambda i: (0, 0)),          # Wv^T
            pl.BlockSpec(memory_space=pltpu.MemorySpace.SMEM),  # bg scalar
        ],
        out_specs=pl.BlockSpec((bt, C, H), lambda i: (i, 0, 0)),
    )

    out = pl.pallas_call(
        relation_attention_kernel,
        out_shape=jax.ShapeDtypeStruct((B, C, H), out_dtype),
        grid_spec=grid_spec,
        compiler_params=pltpu.CompilerParams(
            dimension_semantics=("parallel",),
            vmem_limit_bytes=vmem_limit,
        ),
    )(p_h, x_h, mask_bias, vecs, wv_t, bg_r)

    return out


def reference(p, x, mask, wq, bq, wk, bk, wv, bv, ws, bs, wg, bg):
    """Pure-JAX transcription of the PyTorch forward (for verification)."""
    B, C, H = p.shape
    L = x.shape[1]
    q = p @ wq.T + bq
    k = x @ wk.T + bk
    qe = jnp.broadcast_to(q[:, :, None, :], (B, C, L, H))
    ke = jnp.broadcast_to(k[:, None, :, :], (B, C, L, H))
    temp = jnp.concatenate([qe, ke], axis=3)
    score = (temp @ ws.T + bs)[..., 0]                 # (B, C, L)
    inv_mask = 1.0 - jnp.broadcast_to(mask[:, None, :], score.shape)
    score = jnp.where(inv_mask == 1.0, -1.0e9, score)
    score = jax.nn.softmax(score, axis=2)
    v = x @ wv.T + bv
    out = jnp.einsum('bcl,bld->bcd', score, v) + p
    g = jax.nn.sigmoid(jnp.concatenate([out, p], axis=2) @ wg.T + bg)
    return g * out + (1.0 - g) * p


if __name__ == "__main__":
    # L chosen as a multiple of 16 so the bf16 (bt, L, H) -> (bt*L, H) reshape
    # for the value matmul is a free view (no sublane repack).
    B, C, L, H = 4, 8, 16, 32
    key = jax.random.PRNGKey(0)
    keys = jax.random.split(key, 12)

    def lin_init(kw, kb, out_f, in_f):
        bound = 1.0 / jnp.sqrt(in_f)
        w = jax.random.uniform(kw, (out_f, in_f), jnp.float32, -bound, bound)
        b = jax.random.uniform(kb, (out_f,), jnp.float32, -bound, bound)
        return w, b

    wq, bq = lin_init(keys[0], keys[1], H, H)
    wk, bk = lin_init(keys[2], keys[3], H, H)
    wv, bv = lin_init(keys[4], keys[5], H, H)
    ws, bs = lin_init(keys[6], keys[7], 1, 2 * H)
    wg, bg = lin_init(keys[8], keys[9], 1, 2 * H)

    p = jax.random.normal(keys[10], (B, C, H), jnp.float32)
    x = jax.random.normal(keys[11], (B, L, H), jnp.float32)
    # mask: 1.0 = valid, 0.0 = padding (as in the torch call convention)
    lengths = jnp.array([L, L - 3, L - 7, 5])
    mask = (jnp.arange(L)[None, :] < lengths[:, None]).astype(jnp.float32)

    out = relation_attention(p, x, mask, wq, bq, wk, bk, wv, bv, ws, bs, wg, bg)
    out = jax.block_until_ready(out)
    assert out.shape == (B, C, H)

    # (1) Check against the reference evaluated on the same bf16-rounded inputs
    #     the kernel actually consumes -> isolates kernel arithmetic error
    #     (bf16 x bf16 MXU products are exact in f32, softmax/gate stay f32,
    #     approx EUP reciprocal adds ~1e-3 relative).
    rd = lambda a: a.astype(jnp.bfloat16).astype(jnp.float32)
    ref_q = reference(rd(p), rd(x), mask, wq, bq, wk, bk, rd(wv), bv, ws, bs, wg, bg)
    assert jnp.allclose(out, ref_q, atol=1.5e-2, rtol=1.5e-2), "mismatch vs rounded-input reference"

    # (2) Loose sanity check against the full-precision reference (accounts for
    #     bf16 quantization of p / x / Wv in HBM).
    ref = reference(p, x, mask, wq, bq, wk, bk, wv, bv, ws, bs, wg, bg)
    assert jnp.allclose(out, ref, atol=8e-2, rtol=8e-2), "mismatch vs f32 reference"

    print("KERNEL_OK")
</pallas_src>

<mosaic_0001>
module attributes {stable_mosaic.version = 11 : i64} {
  func.func @relation_attention_kernel(%arg0: i32, %arg1: memref<1x8x32xbf16, #tpu.memory_space<vmem>>, %arg2: memref<1x16x32xbf16, #tpu.memory_space<vmem>>, %arg3: memref<1x1x16xf32, #tpu.memory_space<vmem>>, %arg4: memref<5x32xf32, #tpu.memory_space<vmem>>, %arg5: memref<32x32xbf16, #tpu.memory_space<vmem>>, %arg6: memref<1xf32, #tpu.memory_space<smem>>, %arg7: memref<1x8x32xf32, #tpu.memory_space<vmem>>) attributes {dimension_semantics = [#tpu.dimension_semantics<parallel>], iteration_bounds = array<i64: 4>, scalar_prefetch = 0 : i64, scratch_operands = 0 : i64, tpu.core_type = #tpu.core_type<tc>, window_params = [{transform_indices = @transform_0, window_bounds = array<i64: 1, 8, 32>}, {transform_indices = @transform_1, window_bounds = array<i64: 1, 16, 32>}, {transform_indices = @transform_2, window_bounds = array<i64: 1, 1, 16>}, {pipeline_mode = #tpu.pipeline_mode<synchronous>, transform_indices = @transform_3, window_bounds = array<i64: 5, 32>}, {pipeline_mode = #tpu.pipeline_mode<synchronous>, transform_indices = @transform_4, window_bounds = array<i64: 32, 32>}, {transform_indices = @transform_5, window_bounds = array<i64: 1>}, {transform_indices = @transform_6, window_bounds = array<i64: 1, 8, 32>}]} {
    %c0 = arith.constant 0 : index
    %c0_0 = arith.constant 0 : index
    %c0_1 = arith.constant 0 : index
    %0 = vector.load %arg2[%c0, %c0_0, %c0_1] : memref<1x16x32xbf16, #tpu.memory_space<vmem>>, vector<1x16x32xbf16>
    %c0_2 = arith.constant 0 : index
    %c0_3 = arith.constant 0 : index
    %c0_4 = arith.constant 0 : index
    %1 = vector.load %arg1[%c0_2, %c0_3, %c0_4] : memref<1x8x32xbf16, #tpu.memory_space<vmem>>, vector<1x8x32xbf16>
    %2 = arith.extf %1 : vector<1x8x32xbf16> to vector<1x8x32xf32>
    %3 = arith.extf %0 : vector<1x16x32xbf16> to vector<1x16x32xf32>
    %c0_5 = arith.constant 0 : index
    %c0_6 = arith.constant 0 : index
    %4 = vector.load %arg4[%c0_5, %c0_6] : memref<5x32xf32, #tpu.memory_space<vmem>>, vector<1x32xf32>
    %c1 = arith.constant 1 : index
    %c0_7 = arith.constant 0 : index
    %5 = vector.load %arg4[%c1, %c0_7] : memref<5x32xf32, #tpu.memory_space<vmem>>, vector<1x32xf32>
    %c2 = arith.constant 2 : index
    %c0_8 = arith.constant 0 : index
    %6 = vector.load %arg4[%c2, %c0_8] : memref<5x32xf32, #tpu.memory_space<vmem>>, vector<1x32xf32>
    %c3 = arith.constant 3 : index
    %c0_9 = arith.constant 0 : index
    %7 = vector.load %arg4[%c3, %c0_9] : memref<5x32xf32, #tpu.memory_space<vmem>>, vector<1x32xf32>
    %c4 = arith.constant 4 : index
    %c0_10 = arith.constant 0 : index
    %8 = vector.load %arg4[%c4, %c0_10] : memref<5x32xf32, #tpu.memory_space<vmem>>, vector<1x32xf32>
    %9 = vector.shape_cast %4 : vector<1x32xf32> to vector<1x1x32xf32>
    %10 = vector.broadcast %9 : vector<1x1x32xf32> to vector<1x8x32xf32>
    %11 = arith.mulf %2, %10 : vector<1x8x32xf32>
    %cst = arith.constant dense<0.000000e+00> : vector<1x8xf32>
    %12 = vector.multi_reduction <add>, %11, %cst [2] : vector<1x8x32xf32> to vector<1x8xf32>
    %13 = vector.shape_cast %5 : vector<1x32xf32> to vector<1x1x32xf32>
    %14 = vector.broadcast %13 : vector<1x1x32xf32> to vector<1x16x32xf32>
    %15 = arith.mulf %3, %14 : vector<1x16x32xf32>
    %cst_11 = arith.constant dense<0.000000e+00> : vector<1x16xf32>
    %16 = vector.multi_reduction <add>, %15, %cst_11 [2] : vector<1x16x32xf32> to vector<1x16xf32>
    %17 = vector.shape_cast %12 : vector<1x8xf32> to vector<1x8x1xf32>
    %18 = vector.shape_cast %16 : vector<1x16xf32> to vector<1x1x16xf32>
    %19 = vector.broadcast %17 : vector<1x8x1xf32> to vector<1x8x16xf32>
    %20 = vector.broadcast %18 : vector<1x1x16xf32> to vector<1x8x16xf32>
    %21 = arith.addf %19, %20 : vector<1x8x16xf32>
    %c0_12 = arith.constant 0 : index
    %c0_13 = arith.constant 0 : index
    %c0_14 = arith.constant 0 : index
    %22 = vector.load %arg3[%c0_12, %c0_13, %c0_14] : memref<1x1x16xf32, #tpu.memory_space<vmem>>, vector<1x1x16xf32>
    %23 = vector.broadcast %22 : vector<1x1x16xf32> to vector<1x8x16xf32>
    %24 = arith.addf %21, %23 : vector<1x8x16xf32>
    %cst_15 = arith.constant dense<0xFF800000> : vector<1x8xf32>
    %25 = vector.multi_reduction <maximumf>, %24, %cst_15 [2] : vector<1x8x16xf32> to vector<1x8xf32>
    %26 = vector.shape_cast %25 : vector<1x8xf32> to vector<1x8x1xf32>
    %27 = vector.broadcast %26 : vector<1x8x1xf32> to vector<1x8x16xf32>
    %28 = arith.subf %24, %27 : vector<1x8x16xf32>
    %29 = math.exp %28 : vector<1x8x16xf32>
    %cst_16 = arith.constant dense<0.000000e+00> : vector<1x8xf32>
    %30 = vector.multi_reduction <add>, %29, %cst_16 [2] : vector<1x8x16xf32> to vector<1x8xf32>
    %31 = vector.shape_cast %30 : vector<1x8xf32> to vector<1x8x1xf32>
    %32 = tpu.reciprocal %31 {approx = true} : vector<1x8x1xf32> -> vector<1x8x1xf32>
    %33 = vector.broadcast %32 : vector<1x8x1xf32> to vector<1x8x16xf32>
    %34 = arith.mulf %29, %33 : vector<1x8x16xf32>
    %35 = vector.shape_cast %0 : vector<1x16x32xbf16> to vector<16x32xbf16>
    %c0_17 = arith.constant 0 : index
    %c0_18 = arith.constant 0 : index
    %36 = vector.load %arg5[%c0_17, %c0_18] : memref<32x32xbf16, #tpu.memory_space<vmem>>, vector<32x32xbf16>
    %cst_19 = arith.constant dense<0.000000e+00> : vector<16x32xf32>
    %37 = tpu.matmul %35, %36, %cst_19 {dimension_numbers = #tpu.dot_dimension_numbers<[1], [0], [0], [1], [0, 0, 1, 1], [], []>} : vector<16x32xbf16>, vector<32x32xbf16>, vector<16x32xf32> -> vector<16x32xf32>
    %38 = vector.shape_cast %37 : vector<16x32xf32> to vector<1x16x32xf32>
    %39 = vector.shape_cast %8 : vector<1x32xf32> to vector<1x1x32xf32>
    %40 = vector.broadcast %39 : vector<1x1x32xf32> to vector<1x16x32xf32>
    %41 = arith.addf %38, %40 : vector<1x16x32xf32>
    %42 = vector.shape_cast %34 : vector<1x8x16xf32> to vector<1x8x16x1xf32>
    %43 = vector.shape_cast %41 : vector<1x16x32xf32> to vector<1x1x16x32xf32>
    %44 = vector.broadcast %42 : vector<1x8x16x1xf32> to vector<1x8x16x32xf32>
    %45 = vector.broadcast %43 : vector<1x1x16x32xf32> to vector<1x8x16x32xf32>
    %46 = arith.mulf %44, %45 : vector<1x8x16x32xf32>
    %cst_20 = arith.constant dense<0.000000e+00> : vector<1x8x32xf32>
    %47 = vector.multi_reduction <add>, %46, %cst_20 [2] : vector<1x8x16x32xf32> to vector<1x8x32xf32>
    %48 = arith.addf %47, %2 : vector<1x8x32xf32>
    %49 = vector.shape_cast %6 : vector<1x32xf32> to vector<1x1x32xf32>
    %50 = vector.broadcast %49 : vector<1x1x32xf32> to vector<1x8x32xf32>
    %51 = arith.mulf %48, %50 : vector<1x8x32xf32>
    %52 = vector.shape_cast %7 : vector<1x32xf32> to vector<1x1x32xf32>
    %53 = vector.broadcast %52 : vector<1x1x32xf32> to vector<1x8x32xf32>
    %54 = arith.mulf %2, %53 : vector<1x8x32xf32>
    %55 = arith.addf %51, %54 : vector<1x8x32xf32>
    %cst_21 = arith.constant dense<0.000000e+00> : vector<1x8xf32>
    %56 = vector.multi_reduction <add>, %55, %cst_21 [2] : vector<1x8x32xf32> to vector<1x8xf32>
    %57 = vector.shape_cast %56 : vector<1x8xf32> to vector<1x8x1xf32>
    %c0_22 = arith.constant 0 : index
    %58 = memref.load %arg6[%c0_22] : memref<1xf32, #tpu.memory_space<smem>>
    %59 = vector.broadcast %58 : f32 to vector<1x8x1xf32>
    %60 = arith.addf %57, %59 : vector<1x8x1xf32>
    %61 = arith.negf %60 : vector<1x8x1xf32>
    %62 = math.exp %61 : vector<1x8x1xf32>
    %cst_23 = arith.constant 1.000000e+00 : f32
    %63 = vector.broadcast %cst_23 : f32 to vector<1x8x1xf32>
    %64 = arith.addf %63, %62 : vector<1x8x1xf32>
    %65 = arith.divf %63, %64 : vector<1x8x1xf32>
    %66 = vector.broadcast %65 : vector<1x8x1xf32> to vector<1x8x32xf32>
    %67 = arith.mulf %66, %48 : vector<1x8x32xf32>
    %cst_24 = arith.constant 1.000000e+00 : f32
    %68 = vector.broadcast %cst_24 : f32 to vector<1x8x1xf32>
    %69 = arith.subf %68, %65 : vector<1x8x1xf32>
    %70 = vector.broadcast %69 : vector<1x8x1xf32> to vector<1x8x32xf32>
    %71 = arith.mulf %70, %2 : vector<1x8x32xf32>
    %72 = arith.addf %67, %71 : vector<1x8x32xf32>
    %c0_25 = arith.constant 0 : index
    %c0_26 = arith.constant 0 : index
    %c0_27 = arith.constant 0 : index
    %73 = vector.load %arg7[%c0_25, %c0_26, %c0_27] : memref<1x8x32xf32, #tpu.memory_space<vmem>>, vector<1x8x32xf32>
    tpu.vector_store %arg7[%c0_25, %c0_26, %c0_27], %72 {strides = array<i32>} : memref<1x8x32xf32, #tpu.memory_space<vmem>>, vector<1x8x32xf32>,
    return
  }
  func.func @transform_0(%arg0: i32) -> (i32, i32, i32) {
    %c0_i32 = arith.constant 0 : i32
    %c0_i32_0 = arith.constant 0 : i32
    %c0_i32_1 = arith.constant 0 : i32
    return %arg0, %c0_i32, %c0_i32_0 : i32, i32, i32
  }
  func.func @transform_1(%arg0: i32) -> (i32, i32, i32) {
    %c0_i32 = arith.constant 0 : i32
    %c0_i32_0 = arith.constant 0 : i32
    %c0_i32_1 = arith.constant 0 : i32
    return %arg0, %c0_i32, %c0_i32_0 : i32, i32, i32
  }
  func.func @transform_2(%arg0: i32) -> (i32, i32, i32) {
    %c0_i32 = arith.constant 0 : i32
    %c0_i32_0 = arith.constant 0 : i32
    %c0_i32_1 = arith.constant 0 : i32
    return %arg0, %c0_i32, %c0_i32_0 : i32, i32, i32
  }
  func.func @transform_3(%arg0: i32) -> (i32, i32) {
    %c0_i32 = arith.constant 0 : i32
    %c0_i32_0 = arith.constant 0 : i32
    %c0_i32_1 = arith.constant 0 : i32
    return %c0_i32, %c0_i32_0 : i32, i32
  }
  func.func @transform_4(%arg0: i32) -> (i32, i32) {
    %c0_i32 = arith.constant 0 : i32
    %c0_i32_0 = arith.constant 0 : i32
    %c0_i32_1 = arith.constant 0 : i32
    return %c0_i32, %c0_i32_0 : i32, i32
  }
  func.func @transform_5(%arg0: i32) -> i32 {
    %c0_i32 = arith.constant 0 : i32
    %c0_i32_0 = arith.constant 0 : i32
    return %c0_i32 : i32
  }
  func.func @transform_6(%arg0: i32) -> (i32, i32, i32) {
    %c0_i32 = arith.constant 0 : i32
    %c0_i32_0 = arith.constant 0 : i32
    %c0_i32_1 = arith.constant 0 : i32
    return %arg0, %c0_i32, %c0_i32_0 : i32, i32, i32
  }
}

</mosaic_0001>

<bundles_post_ra>
// kernel: tpu_custom_call.1
= control target key start
LH: loop header
LB: loop body
LE: loop exit
PB: predicated region body
PF: predicated region fallthrough
CT: control target
= control target key end

     0   :  { %s1698_s0 = inlined_call_operand.hbm [shape: bf16[4,8,32], index: 0, kind: input, shape index: {}]   ;;  %s1699_s1 = inlined_call_operand.hbm [shape: bf16[4,16,32], index: 1, kind: input, shape index: {}]   ;;  %s1700_s2 = inlined_call_operand.hbm [shape: f32[4,1,16], index: 2, kind: input, shape index: {}]   ;;  %s1701_s3 = inlined_call_operand.hbm [shape: f32[5,32], index: 3, kind: input, shape index: {}]   ;;  %s1702_s4 = inlined_call_operand.vmem [shape: bf16[32,32], index: 4, kind: input, shape index: {}]   ;;  %s1703_s5 = inlined_call_operand.<no memory space> [shape: f32[1], index: 5, kind: input, shape index: {}]   ;;  %s1704_s6 = inlined_call_operand.hbm [shape: f32[4,8,32], index: 6, kind: output, shape index: {}]  }
   0x1   :  { %1717 = sst [smem:[#allocation19_spill]] %s1699_s1 }
   0x2   :  { %11 = sst [smem:[#allocation2]] %s1703_s5 }
   0x3   :  { %12 = vsyncpa [#allocation4], 0 }
   0x4   :  { %14 = vsyncpa [#allocation4 + $0x1], 0 }
   0x5   :  { %15 = vsyncpa [#allocation7], 0 }
   0x6   :  { %17 = vsyncpa [#allocation7 + $0x1], 0 }
   0x7   :  { %18 = vsyncpa [#allocation10], 0 }
   0x8   :  { %19 = vsyncpa [#allocation5], 0 }
   0x9   :  { %21 = vsyncpa [#allocation5 + $0x1], 0  ;;  %s1310_s23 = smov 0   ;;  %s1312_s24 = smov 0  }
   0xa   :  { %s1314_s25 = smov 0   ;;  %s1316_s26 = smov 0  }
   0xb LB: > { %1718 = sst [smem:[#allocation16_spill]] %s1257_s25  ;;  %s1331_s5 = sadd.s32 1, %s1261_s26   ;;  %s1261_s26 = sphi %s1316_s26, %s1739_s26   ;;  %s1257_s25 = sphi %s1314_s25, %s1741_s25   ;;  %s1253_s24 = sphi %s1312_s24, %s1743_s24   ;;  %s1249_s23 = sphi %s1310_s23, %s1742_s23  }
   0xc   : > { %1719 = sst [smem:[#allocation17_spill]] %s1331_s5  ;;  %s34_s27 = sadd.s32 1, %s1257_s25 }
   0xd   : > { %s31_s28 = ssub.s32 %s1261_s26, %s1331_s5  ;;  %p1705_p0 = scmp.ne.s32.totalorder %s1257_s25, %s1253_s24 }
   0xe   : > { %p32_p1 = scmp.eq.s32.totalorder %s31_s28, 0  ;;  %p42_p2 = scmp.eq.s32.totalorder %s1261_s26, 0 }
   0xf   : > { %p1017_p3 = scmp.lt.s32.totalorder %s1261_s26, 4  ;;  %s1347_s30 = sand.u32 1, %s1257_s25  }
  0x10   : > { %s1341_s29 = scalar_select %p32_p1, %s1257_s25, %s34_s27  }
  0x11   : > { %p43_p4 = por %p42_p2, %p1705_p0  ;;  %s247_s7 = sand.u32 1, %s1261_s26  }
  0x12   : > { %1720 = sst [smem:[#allocation18_spill]] %s1341_s29  ;;  %s950_s8 = sshll.u32 %s1347_s30, 3 }
  0x13   : > { %p1351_p5 = pnand %p1017_p3, %p43_p4  ;;  %s974_s10 = sshll.u32 %s1261_s26, 7 }
  0x14   : > { %s1722_s1 = sld [smem:[#allocation19_spill]]  ;;  %s251_s14 = scalar_lea.vmem [#allocation6], %s950_s8 }
  0x15   : > { %s1721_s9 = scalar_select %p1351_p5, 1, 0 }
  0x16   : > { %s258_s15 = sshll.u32 %s251_s14, 4  ;;  %s1363_s16 = scalar_lea.sflag [#allocation7], %s247_s7  ;;  %s1361_s15 = int_to_ptr.vmem [resolvable:$true] %s258_s15 }
  0x17   : > { %p1369_p7 = pneg %p1351_p5 }
  0x19   : > { %s1723_s18 = scalar_select %p1369_p7, 1, 0 }
  0x1a   : > { %s1359_s13 = scalar_lea.hbm %s1722_s1, %s974_s10  ;;  %s1074_s21 = scalar_lea.hbm %s1722_s1, 512 }
  0x1b   : > { %s1069_s17 = scalar_lea.hbm %s1359_s13, 128  ;;  %p1075_p10 = scmp.lt.u32.totalorder %s1359_s13, %s1722_s1 }
  0x1c   : > { %p1070_p6 = scmp.ne.s32.totalorder %s1359_s13, %s1069_s17  ;;  %p1076_p11 = scmp.lt.u32.totalorder %s1074_s21, %s1069_s17 }
  0x1d   : > { %p1078_p13 = scmp.lt.u32.totalorder %s1069_s17, %s1359_s13 }
  0x1e   : > { %p1072_p8 = pnand %p1369_p7, %p1070_p6  ;;  %p1077_p12 = por %p1076_p11, %p1075_p10 }
  0x20   : > { %p1073_p9 = pneg %p1072_p8  ;;  %p1079_p1 = por %p1078_p13, %p1077_p12 }
  0x22   : > { %p1080_p2 = pnand %p1079_p1, %p1073_p9 }
  0x24   : > { %1083 = shalt.err (!%p1080_p2)
}
  0x25   : > { %s1084_s28 = scalar_lea.vmem %s1361_s15, 128  ;;  %s1263_s7 = smov [#allocation6]  }
  0x26   : > { %p1085_p3 = scmp.ne.s32.totalorder %s1361_s15, %s1084_s28  ;;  %s1089_s8 = sshll.u32 %s1263_s7, 4  ;;  %s1090_s8 = int_to_ptr.vmem [resolvable:$false] %s1089_s8 }
  0x27   : > { %s1091_s10 = scalar_lea.vmem %s1090_s8, 256  ;;  %p1092_p8 = scmp.lt.s32.totalorder %s1361_s15, %s1090_s8 }
  0x28   : > { %p1087_p4 = pnand %p1085_p3, %p1369_p7  ;;  %p1093_p0 = scmp.lt.s32.totalorder %s1091_s10, %s1084_s28 }
  0x2a   : > { %p1088_p6 = pneg %p1087_p4  ;;  %p1094_p10 = por %p1093_p0, %p1092_p8 }
  0x2c   : > { %p1095_p11 = pnand %p1094_p10, %p1088_p6 }
  0x2e   : > { %1098 = shalt.err (!%p1095_p11)
}
  0x2f   : > { %s1264_s11 = smov 64   ;;  %s1265_s12 = smov 4  }
  0x30   : > { %1008 = dma.hbm_to_vmem [thread:$0]  (!%p1351_p5), %s1359_s13, 128, %s1361_s15, %s1363_s16, %s1264_s11, %s1264_s11, %s1265_s12  }
  0x31   : > { %s1394_s14 = sadd.s32 4294967295, %s1261_s26   ;;  %s944_s17 = sadd.s32 4294967294, %s1261_s26  }
  0x32   : > { %p47_p0 = scmp.ne.s32.totalorder %s1253_s24, %s1249_s23  ;;  %p1709_p9 = scmp.eq.s32.totalorder %s1394_s14, 0 }
  0x33   : > { %p186_p12 = scmp.eq.s32.totalorder %s1394_s14, 3  ;;  %p192_p13 = scmp.eq.s32.totalorder %s944_s17, 3 }
  0x34   : > { %p1403_p1 = por %p1709_p9, %p47_p0  ;;  %p945_p2 = scmp.ge.s32.totalorder %s1261_s26, 1 }
  0x35   : > { %p1725_p3 = scmp.ne.s32.totalorder %s1257_s25, %s1253_s24  ;;  %p1415_p6 = por %p192_p13, %p47_p0 }
  0x36   : > { %s1724_s19 = scalar_select %p1403_p1, 1, 0 }
  0x37   : > { %p1411_p4 = por %p186_p12, %p1725_p3  ;;  %p199_p8 = scmp.lt.s32.totalorder %s1261_s26, 5 }
  0x38   : > { %s1727_s15 = scalar_select %p1415_p6, 1, 0 }
  0x39   : > { %s1726_s13 = scalar_select %p1411_p4, 1, 0 }
  0x3a   : > { %p1420_p10 = pnand %p945_p2, %p199_p8  ;;  %s1266_s21 = smov [#allocation9]  }
  0x3b   : > { %s212_s22 = sshll.u32 %s1266_s21, 4  ;;  %s948_s27 = sshll.u32 %s1347_s30, 2  ;;  %s213_s22 = int_to_ptr.vmem [resolvable:$true] %s212_s22 }
  0x3c   : > { %s1728_s20 = scalar_select %p1420_p10, 1, 0 }
  0x3d   : > { %p998_p11 = pneg %p1420_p10  ;;  %s949_s28 = sshll.u32 %s1261_s26, 6 }
  0x3e   : > { %s233_s7 = scalar_lea.vmem [#allocation3], %s948_s27  ;;  %s1437_s17 = scalar_lea.hbm %s1698_s0, %s949_s28 }
  0x3f   : > { %s240_s8 = sshll.u32 %s233_s7, 4  ;;  %p1430_p0 = pnand %p998_p11, %p1709_p9  ;;  %s1439_s8 = int_to_ptr.vmem [resolvable:$true] %s240_s8 }
  0x40   : > { %s953_s21 = sshll.u32 %s1261_s26, 4  ;;  %s1099_s25 = scalar_lea.hbm %s1701_s3, 128 }
  0x41   : > { %p1100_p12 = scmp.ne.s32.totalorder %s1701_s3, %s1099_s25  ;;  %p1101_p13 = pneg %p1430_p0 }
  0x42   : > { %p1106_p8 = scmp.lt.u32.totalorder %s1099_s25, %s1701_s3 }
  0x43   : > { %p1102_p2 = pnand %p1101_p13, %p1100_p12 }
  0x45   : > { %p1103_p3 = pneg %p1102_p2 }
  0x47   : > { %p1108_p11 = pnand %p1106_p8, %p1103_p3 }
  0x49   : > { %1111 = shalt.err (!%p1108_p11)
}
  0x4a   : > { %s1112_s28 = scalar_lea.vmem %s213_s22, 128  ;;  %p1120_p1 = scmp.lt.s32.totalorder %s213_s22, %s213_s22 }
  0x4b   : > { %p1113_p9 = scmp.ne.s32.totalorder %s213_s22, %s1112_s28  ;;  %p1121_p10 = scmp.lt.s32.totalorder %s1112_s28, %s1112_s28 }
  0x4d   : > { %p1115_p6 = pnand %p1113_p9, %p1101_p13  ;;  %p1122_p5 = por %p1121_p10, %p1120_p1 }
  0x4f   : > { %p1116_p4 = pneg %p1115_p6 }
  0x51   : > { %p1123_p7 = pnand %p1122_p5, %p1116_p4 }
  0x53   : > { %1126 = shalt.err (!%p1123_p7)
}
  0x54   : > { %1001 = dma.hbm_to_vmem [thread:$0]  (!%p1430_p0), %s1701_s3, 128, %s213_s22, [#allocation10]  }
  0x55   : > { %s230_s25 = scalar_lea.sflag [#allocation4], %s1347_s30  ;;  %s1127_s5 = scalar_lea.hbm %s1437_s17, 64 }
  0x56   : > { %p1128_p9 = scmp.ne.s32.totalorder %s1437_s17, %s1127_s5  ;;  %p1730_p6 = scmp.ne.s32.totalorder %s1723_s18, 0 }
  0x57   : > { %s1132_s10 = scalar_lea.hbm %s1698_s0, 256  ;;  %p1133_p5 = scmp.lt.u32.totalorder %s1437_s17, %s1698_s0 }
  0x58   : > { %p1130_p12 = pnand %p1128_p9, %p1730_p6  ;;  %p1134_p7 = scmp.lt.u32.totalorder %s1132_s10, %s1127_s5 }
  0x59   : > { %p1136_p10 = scmp.lt.u32.totalorder %s1127_s5, %s1437_s17 }
  0x5a   : > { %p1131_p1 = pneg %p1130_p12  ;;  %p1135_p4 = por %p1134_p7, %p1133_p5 }
  0x5c   : > { %p1137_p13 = por %p1136_p10, %p1135_p4 }
  0x5e   : > { %p1138_p2 = pnand %p1137_p13, %p1131_p1 }
  0x60   : > { %1141 = shalt.err (!%p1138_p2)
}
  0x61   : > { %s1142_s22 = scalar_lea.vmem %s1439_s8, 64  ;;  %s1267_s28 = smov [#allocation3]  }
  0x62   : > { %p1143_p0 = scmp.ne.s32.totalorder %s1439_s8, %s1142_s22  ;;  %s1147_s1 = sshll.u32 %s1267_s28, 4  ;;  %s1148_s1 = int_to_ptr.vmem [resolvable:$false] %s1147_s1 }
  0x63   : > { %s1149_s29 = scalar_lea.vmem %s1148_s1, 128  ;;  %p1150_p11 = scmp.lt.s32.totalorder %s1439_s8, %s1148_s1 }
  0x64   : > { %p1145_p3 = pnand %p1143_p0, %p1730_p6  ;;  %p1151_p9 = scmp.lt.s32.totalorder %s1149_s29, %s1142_s22 }
  0x66   : > { %p1146_p8 = pneg %p1145_p3  ;;  %p1152_p12 = por %p1151_p9, %p1150_p11 }
  0x68   : > { %p1153_p5 = pnand %p1152_p12, %p1146_p8 }
  0x6a   : > { %1156 = shalt.err (!%p1153_p5)
}
  0x6b   : > { %p1731_p1 = scmp.ne.s32.totalorder %s1721_s9, 0  ;;  %s1485_s27 = scalar_lea.hbm %s1700_s2, %s953_s21 }
  0x6c   : > { %s271_s10 = scalar_lea.vmem [#allocation8], %s1347_s30  ;;  %s1157_s11 = scalar_lea.hbm %s1485_s27, 16 }
  0x6d   : > { %1005 = dma.hbm_to_vmem [thread:$0]  (!%p1731_p1), %s1437_s17, 64, %s1439_s8, %s230_s25  }
  0x6e   : > { %s278_s7 = sshll.u32 %s271_s10, 4  ;;  %p1158_p7 = scmp.ne.s32.totalorder %s1485_s27, %s1157_s11  ;;  %s279_s7 = int_to_ptr.vmem [resolvable:$true] %s278_s7 }
  0x6f   : > { %s1162_s17 = scalar_lea.hbm %s1700_s2, 64  ;;  %p1163_p13 = scmp.lt.u32.totalorder %s1485_s27, %s1700_s2 }
  0x70   : > { %p1160_p4 = pnand %p1158_p7, %p1730_p6  ;;  %p1164_p2 = scmp.lt.u32.totalorder %s1162_s17, %s1157_s11 }
  0x71   : > { %p1166_p3 = scmp.lt.u32.totalorder %s1157_s11, %s1485_s27 }
  0x72   : > { %p1161_p10 = pneg %p1160_p4  ;;  %p1165_p0 = por %p1164_p2, %p1163_p13 }
  0x74   : > { %p1167_p8 = por %p1166_p3, %p1165_p0 }
  0x76   : > { %p1168_p11 = pnand %p1167_p8, %p1161_p10 }
  0x78   : > { %1171 = shalt.err (!%p1168_p11)
}
  0x79   : > { %s1172_s30 = scalar_lea.vmem %s279_s7, 16  ;;  %s1268_s21 = smov [#allocation8]  }
  0x7a   : > { %p1173_p9 = scmp.ne.s32.totalorder %s279_s7, %s1172_s30  ;;  %s1177_s1 = sshll.u32 %s1268_s21, 4  ;;  %s1178_s1 = int_to_ptr.vmem [resolvable:$false] %s1177_s1 }
  0x7b   : > { %s1179_s29 = scalar_lea.vmem %s1178_s1, 32  ;;  %p1180_p7 = scmp.lt.s32.totalorder %s279_s7, %s1178_s1 }
  0x7c   : > { %p1175_p12 = pnand %p1173_p9, %p1730_p6  ;;  %p1181_p4 = scmp.lt.s32.totalorder %s1179_s29, %s1172_s30 }
  0x7e   : > { %p1176_p5 = pneg %p1175_p12  ;;  %p1182_p1 = por %p1181_p4, %p1180_p7 }
  0x80   : > { %p1183_p2 = pnand %p1182_p1, %p1176_p5 }
  0x82   : > { %1186 = shalt.err (!%p1183_p2)
}
  0x83   : > { %p1732_p13 = scmp.ne.s32.totalorder %s1721_s9, 0  ;;  %p1733_p10 = scmp.ne.s32.totalorder %s1728_s20, 0 }
  0x84   : > { %s1509_s18 = sand.u32 (!%p1733_p10), 1, %s1253_s24   ;;  %p1734_p6 = scmp.ne.s32.totalorder (!%p1733_p10), %s1724_s19, 0 }
  0x85   : > { %1011 = dma.hbm_to_vmem [thread:$0]  (!%p1732_p13), %s1485_s27, 16, %s279_s7, %s1363_s16  }
  0x86   : > { %287 = sbr.rel (%p1733_p10) target bundleno = 987 (0x3db), region = 44  ;;  %s955_s5 = sshll.u32 (!%p1733_p10), %s1509_s18, 2 }
  0x87   : > { %s290_s12 = scalar_lea.sflag (!%p1733_p10), [#allocation4], %s1509_s18  ;;  %s293_s10 = scalar_lea.vmem (!%p1733_p10), [#allocation3], %s955_s5 }
  0x8d   : > { %1232 = dma.done.wait (%p1734_p6), %s290_s12, 64  }
  0x8e   : > { %1234 = vsyncadd (%p1734_p6), %s290_s12, 4294967232  ;;  %s298_s9 = sand.u32 1, %s1394_s14   ;;  %s956_s16 = sshll.u32 %s1509_s18, 3 }
  0x8f   : > { %s299_s20 = scalar_lea.sflag [#allocation7], %s298_s9  ;;  %s302_s27 = scalar_lea.vmem [#allocation6], %s956_s16 }
  0x90   : > { %1236 = dma.done.wait (%p1734_p6), %s299_s20, 144  }
  0x91   : > { %1238 = vsyncadd (%p1734_p6), %s299_s20, 4294967152  ;;  %s310_s7 = scalar_lea.vmem [#allocation8], %s1509_s18  ;;  %p1735_p1 = scmp.eq.s32.totalorder %s1394_s14, 0 }
  0x93   : > { %1240 = dma.done.wait (%p1735_p1), [#allocation10], 128   ;;  %p1736_p0 = pmov %p1735_p1 }
  0x94   : > { %v353_v0 = vld [vmem:[%s302_s27] sm:$0xff]   ;;  %v960_v1 = vld [vmem:[#allocation9 + $0x1] ss:$0 sm:$0xff]  ;;  %v355_v2 = vld [vmem:[%s293_s10] sm:$0xf]  ;;  %vm369_vm0 = vcmask 261120   ;;  %v387_v13 = vlaneseq }
  0x95   : > { %1242 = vsyncadd (%p1736_p0), [#allocation10], 4294967168  ;;  %v357_v3 = vunpack.c.l.bf16 %v353_v0  ;;  %v358_v4 = vunpack.c.h.bf16 %v353_v0  ;;  %v1530_v5 = vunpack.c.l.bf16 %v355_v2  ;;  %v959_v6 = vld [vmem:[#allocation9] ss:$0 sm:$0xff]  ;;  %vm398_vm1 = vcmask 130112   ;;  %v1058_v29 = vld [vmem:[%s1702_s4] sm:$0xff]  }
  0x96   : > { %v388_v14 = vand.u32 127, %v387_v13  ;;  %v1536_v15 = vshrl.u32 %v387_v13, 7  ;;  %v961_v25 = vld [vmem:[%s310_s7] ss:$0 sm:$0xff]  ;;  %vm423_vm2 = vcmask 130048   ;;  %v1269_v30 = vmov 0.0  }
  0x97   : > { %v377_v7 = vmul.f32 %v960_v1, %v357_v3  ;;  %v378_v8 = vmul.f32 %v960_v1, %v358_v4  ;;  %v368_v9 = vmul.f32 %v959_v6, %v1530_v5  ;;  %978 = vmatprep.subr.bf16.mxu0 %v1269_v30  ;;  %vm1270_vm3 = vmmov 0   ;;  %v1059_v31 = vld [vmem:[%s1702_s4 + $0x8] sm:$0xff]   ;;  %v966_v60 = vld [vmem:[#allocation9 + $0x4] ss:$0 sm:$0xff]  ;;  %s773_s17 = sld [smem:[#allocation2]]  ;;  %s971_s25 = sshll.u32 %s1394_s14, 7 }
  0x98   : > { %v393_v16 = vadd.s32 4294967288, %v388_v14  ;;  %v391_v18 = vsub.s32 %v388_v14, %v1536_v15  ;;  %982 = vmatprep.mubr.msk.bf16.mxu0 %vm1270_vm3, %v1269_v30  ;;  %979 = vmatpush3.bf16.msra.mxu0 %v1058_v29  ;;  %v519_v42 = vsub.s32 1, %v1536_v15  ;;  %v530_v46 = vsub.s32 2, %v1536_v15  ;;  %s351_s28 = scalar_lea.vmem [#allocation11], %s956_s16  ;;  %s1654_s29 = scalar_lea.hbm %s1704_s6, %s971_s25 }
  0x99   : > { %v379_v10 = vsel %vm369_vm0, %v377_v7, 0.0  ;;  %v370_v11 = vsel %vm369_vm0, %v368_v9, 0.0  ;;  %v382_v12 = vsel %vm369_vm0, %v378_v8, 0.0  ;;  %980 = vmatprep.subr.bf16.mxu0 %v1269_v30  ;;  %v508_v47 = vsub.s32 0, %v1536_v15  ;;  %s824_s30 = sshll.u32 %s351_s28, 4  ;;  %s811_s14 = scalar_lea.sflag [#allocation5], %s1509_s18  ;;  %s1656_s30 = int_to_ptr.vmem [resolvable:$true] %s824_s30 }
  0x9a   : > { %380 = vadd.xlane.f32.xlu0 %v379_v10  ;;  %371 = vadd.xlane.f32.xlu1 %v370_v11  ;;  %v396_v19 = vsub.s32 %v393_v16, %v1536_v15  ;;  %v541_v50 = vsub.s32 3, %v1536_v15  ;;  %v552_v52 = vsub.s32 4, %v1536_v15  ;;  %v563_v54 = vsub.s32 5, %v1536_v15  ;;  %s1187_s5 = scalar_lea.vmem %s1656_s30, 128  ;;  %p1737_p8 = scmp.ne.s32.totalorder %s1726_s13, 0 }
  0x9b   : > { %v574_v56 = vsub.s32 6, %v1536_v15  ;;  %v585_v58 = vsub.s32 7, %v1536_v15  ;;  %vm400_vm4 = vcmask 1041409   ;;  %vm401_vm5 = vcmask 1042434   ;;  %p1188_p3 = scmp.ne.s32.totalorder %s1656_s30, %s1187_s5  ;;  %s1271_s12 = smov [#allocation11]  }
  0x9c   : > { %981 = vmatpush3.bf16.msra.mxu0 %v1059_v31  ;;  %vm403_vm6 = vcmask 1043459   ;;  %vm405_vm7 = vcmask 1044484   ;;  %vm407_vm8 = vcmask 1045509   ;;  %vm409_vm9 = vcmask 1046534   ;;  %s1191_s10 = sshll.u32 %s1271_s12, 4  ;;  %s1192_s10 = int_to_ptr.vmem [resolvable:$false] %s1191_s10 }
  0x9d   : > { %vm411_vm10 = vcmask 1047559   ;;  %p1189_p11 = pnand %p1188_p3, %p1737_p8  ;;  %s1193_s9 = scalar_lea.vmem %s1192_s10, 256 }
  0x9e   : > { %383 = vadd.xlane.f32.xlu0 %v382_v12  ;;  %p1194_p12 = scmp.lt.s32.totalorder %s1656_s30, %s1192_s10  ;;  %p1195_p5 = scmp.lt.s32.totalorder %s1193_s9, %s1187_s5 }
  0x9f   : > { %983 = vmatmul.mubr.msk.bf16.vlgmr.msra.gmra.mrb[0].mxu0 %vm369_vm0, %v353_v0  ;;  %p1190_p9 = pneg %p1189_p11 }
  0xa0   : > { %p1196_p7 = por %p1195_p5, %p1194_p12 }
  0xa2   : > { %p1197_p4 = pnand %p1196_p7, %p1190_p9 }
 0x127   : > { %v381_v17 = vpop.xlane.xlu0 %380  ;;  %v372_v23 = vpop.xlane.xlu1 %371 }
 0x128   : > { %v392_v21 = vrot.slane %v381_v17, %v391_v18 }
 0x12b   : > { %v384_v20 = vpop.xlane.xlu0 %383 }
 0x12c   : > { %v397_v22 = vrot.slane %v384_v20, %v396_v19  ;;  %v968_v19 = vld [vmem:[#allocation9 + $0x3] ss:$0 sm:$0xff] }
 0x12e   : > { %v399_v24 = vsel %vm398_vm1, %v397_v22, %v392_v21 }
 0x12f   : > { %v414_v26 = vadd.f32 %v399_v24, %v372_v23 }
 0x131   : > { %v422_v27 = vadd.f32 %v961_v25, %v414_v26  ;;  %v683_v25 = vrot.slane %v1530_v5, 1 }
 0x133   : > { %v424_v28 = vsel %vm423_vm2, %v422_v27, -inf }
 0x134   : > { %425 = vmax.xlane.f32.xlu1 %v424_v28  ;;  %v1575_v28 = vmul.f32 %v968_v19, %v1530_v5 }
 0x136   : > { %v727_v19 = vrot.slane %v1575_v28, 4 }
 0x172   : > { %v493_v37 = vpop.f32.mrb[0].mxu0 }
 0x173   : > { %v984_v38 = vpop.f32.mrb[1].mxu0  ;;  %v1559_v61 = vadd.f32 %v966_v60, %v493_v37 }
 0x174   : > { %v496_v39 = vpop.f32.mrb[2].mxu0 }
 0x175   : > { %v985_v40 = vpop.f32.mrb[3].mxu0  ;;  %v1561_v62 = vadd.f32 %v966_v60, %v496_v39 }
 0x1c1   : > { %v426_v32 = vpop.xlane.xlu1 %425 }
 0x1c2   : > { %v427_v33 = vsub.f32 %v422_v27, %v426_v32 }
 0x1c4   : > { %v428_v34 = vmul.f32 1.442695, %v427_v33 }
 0x1c6   : > { %1061 = vpow2.f32 %v428_v34 }
 0x1d0   : > { %v1062_v35 = vpop.eup %1061 }
 0x1d1   : > { %v430_v36 = vsel %vm423_vm2, %v1062_v35, 0.0 }
 0x1d2   : > { %431 = vadd.xlane.f32.xlu0 %v430_v36 }
 0x25f   : > { %v432_v41 = vpop.xlane.xlu0 %431 }
 0x260   : > { %1063 = vrcp.f32 %v432_v41  ;;  %v1583_v41 = vld [vmem:[#allocation9 + $0x2] ss:$0 sm:$0xff] }
 0x26a   : > { %v1064_v43 = vpop.eup %1063 }
 0x26b   : > { %v434_v44 = vmul.f32 %v1064_v43, %v1062_v35  ;;  %v684_v43 = vrot.slane %v1530_v5, 2 }
 0x26d   : > { %v520_v45 = vrot.slane %v434_v44, %v519_v42  ;;  %v531_v48 = vrot.slane %v434_v44, %v530_v46  ;;  %v509_v49 = vrot.slane %v434_v44, %v508_v47  ;;  %v542_v51 = vrot.slane %v434_v44, %v541_v50 }
 0x26e   : > { %v553_v53 = vrot.slane %v434_v44, %v552_v52  ;;  %v564_v55 = vrot.slane %v434_v44, %v563_v54  ;;  %v575_v57 = vrot.slane %v434_v44, %v574_v56  ;;  %v586_v59 = vrot.slane %v434_v44, %v585_v58 }
 0x26f   : > { %526 = vbcast.lane.b32.xlu0 %v520_v45, 264  ;;  %522 = vbcast.lane.b32.xlu1 %v520_v45, 256  ;;  %v724_v42 = vrot.slane %v1575_v28, 1  ;;  %v725_v46 = vrot.slane %v1575_v28, 2  ;;  %v686_v58 = vrot.slane %v1530_v5, 4 }
 0x273   : > { %533 = vbcast.lane.b32.xlu1 %v531_v48, 256  ;;  %515 = vbcast.lane.b32.xlu0 %v509_v49, 264 }
 0x277   : > { %537 = vbcast.lane.b32.xlu1 %v531_v48, 264  ;;  %548 = vbcast.lane.b32.xlu0 %v542_v51, 264 }
 0x27b   : > { %559 = vbcast.lane.b32.xlu0 %v553_v53, 264  ;;  %511 = vbcast.lane.b32.xlu1 %v509_v49, 256 }
 0x27f   : > { %570 = vbcast.lane.b32.xlu0 %v564_v55, 264  ;;  %544 = vbcast.lane.b32.xlu1 %v542_v51, 256  ;;  %v685_v51 = vrot.slane %v1530_v5, 3 }
 0x283   : > { %581 = vbcast.lane.b32.xlu0 %v575_v57, 264  ;;  %555 = vbcast.lane.b32.xlu1 %v553_v53, 256 }
 0x287   : > { %592 = vbcast.lane.b32.xlu0 %v586_v59, 264  ;;  %566 = vbcast.lane.b32.xlu1 %v564_v55, 256 }
 0x28b   : > { %577 = vbcast.lane.b32.xlu1 %v575_v57, 256 }
 0x28f   : > { %588 = vbcast.lane.b32.xlu1 %v586_v59, 256 }
 0x2e1   : > { %v527_v63 = vpop.permute.xlu0 %526  ;;  %v523_v0 = vpop.permute.xlu1 %522 }
 0x2e2   : > { %v597_v1 = vmul.f32 %v527_v63, %v1561_v62  ;;  %v596_v2 = vmul.f32 %v523_v0, %v1559_v61 }
 0x2e4   : > { %v620_v3 = vsel %vm369_vm0, %v597_v1, 0.0  ;;  %v619_v4 = vsel %vm369_vm0, %v596_v2, 0.0 }
 0x2e5   : > { %v621_v6 = vadd.f32 %v620_v3, %v619_v4  ;;  %v534_v7 = vpop.permute.xlu1 %533  ;;  %v516_v8 = vpop.permute.xlu0 %515 }
 0x2e6   : > { %v598_v10 = vmul.f32 %v534_v7, %v1559_v61  ;;  %v595_v17 = vmul.f32 %v516_v8, %v1561_v62 }
 0x2e7   : > { %v622_v9 = vrot.slane %v621_v6, 4 }
 0x2e8   : > { %v628_v16 = vsel %vm369_vm0, %v598_v10, 0.0  ;;  %v611_v29 = vsel %vm369_vm0, %v595_v17, 0.0 }
 0x2e9   : > { %v623_v11 = vadd.f32 %v622_v9, %v621_v6  ;;  %v538_v12 = vpop.permute.xlu1 %537  ;;  %v549_v13 = vpop.permute.xlu0 %548  ;;  %v726_v6 = vrot.slane %v1575_v28, 3  ;;  %v687_v9 = vrot.slane %v1530_v5, 5 }
 0x2ea   : > { %v599_v14 = vmul.f32 %v538_v12, %v1561_v62  ;;  %v601_v33 = vmul.f32 %v549_v13, %v1561_v62 }
 0x2eb   : > { %v624_v15 = vrot.slane %v623_v11, 2 }
 0x2ec   : > { %v629_v18 = vsel %vm369_vm0, %v599_v14, 0.0  ;;  %v638_v48 = vsel %vm369_vm0, %v601_v33, 0.0 }
 0x2ed   : > { %v625_v20 = vadd.f32 %v624_v15, %v623_v11  ;;  %v630_v21 = vadd.f32 %v629_v18, %v628_v16  ;;  %v560_v22 = vpop.permute.xlu0 %559  ;;  %v512_v23 = vpop.permute.xlu1 %511 }
 0x2ee   : > { %v594_v24 = vmul.f32 %v512_v23, %v1559_v61  ;;  %v603_v44 = vmul.f32 %v560_v22, %v1561_v62 }
 0x2ef   : > { %v626_v26 = vrot.slane %v625_v20, 1  ;;  %v631_v27 = vrot.slane %v630_v21, 4 }
 0x2f0   : > { %v610_v30 = vsel %vm369_vm0, %v594_v24, 0.0  ;;  %v647_v59 = vsel %vm369_vm0, %v603_v44, 0.0 }
 0x2f1   : > { %v627_v31 = vadd.f32 %v626_v26, %v625_v20  ;;  %v632_v32 = vadd.f32 %v631_v27, %v630_v21  ;;  %v612_v34 = vadd.f32 %v611_v29, %v610_v30  ;;  %v571_v35 = vpop.permute.xlu0 %570  ;;  %v545_v36 = vpop.permute.xlu1 %544 }
 0x2f2   : > { %v600_v37 = vmul.f32 %v545_v36, %v1559_v61  ;;  %v605_v60 = vmul.f32 %v571_v35, %v1561_v62 }
 0x2f3   : > { %v1581_v38 = vadd.f32 %v683_v25, %v627_v31  ;;  %v633_v39 = vrot.slane %v632_v32, 2  ;;  %v613_v40 = vrot.slane %v612_v34, 4 }
 0x2f4   : > { %v637_v45 = vsel %vm369_vm0, %v600_v37, 0.0  ;;  %v656_v15 = vsel %vm369_vm0, %v605_v60, 0.0 }
 0x2f5   : > { %v634_v47 = vadd.f32 %v633_v39, %v632_v32  ;;  %v614_v49 = vadd.f32 %v613_v40, %v612_v34  ;;  %v556_v50 = vpop.permute.xlu1 %555  ;;  %v639_v52 = vadd.f32 %v638_v48, %v637_v45  ;;  %v582_v53 = vpop.permute.xlu0 %581  ;;  %v711_v55 = vmul.f32 %v1583_v41, %v1581_v38 }
 0x2f6   : > { %v602_v54 = vmul.f32 %v556_v50, %v1559_v61  ;;  %v607_v8 = vmul.f32 %v582_v53, %v1561_v62  ;;  %v790_v20 = vrot.slane %v1581_v38, 7 }
 0x2f7   : > { %v635_v56 = vrot.slane %v634_v47, 1  ;;  %v615_v57 = vrot.slane %v614_v49, 2  ;;  %v640_v63 = vrot.slane %v639_v52, 4  ;;  %v740_v11 = vadd.f32 %v724_v42, %v711_v55 }
 0x2f8   : > { %v646_v0 = vsel %vm369_vm0, %v602_v54, 0.0  ;;  %v665_v26 = vsel %vm369_vm0, %v607_v8, 0.0 }
 0x2f9   : > { %v636_v1 = vadd.f32 %v635_v56, %v634_v47  ;;  %v616_v2 = vadd.f32 %v615_v57, %v614_v49  ;;  %v648_v3 = vadd.f32 %v647_v59, %v646_v0  ;;  %v567_v4 = vpop.permute.xlu1 %566  ;;  %v641_v7 = vadd.f32 %v640_v63, %v639_v52  ;;  %v593_v17 = vpop.permute.xlu0 %592 }
 0x2fa   : > { %v604_v10 = vmul.f32 %v567_v4, %v1559_v61  ;;  %v755_v30 = vrot.slane %v740_v11, 7  ;;  %v609_v33 = vmul.f32 %v593_v17, %v1561_v62 }
 0x2fb   : > { %v700_v12 = vadd.f32 %v684_v43, %v636_v1  ;;  %v617_v13 = vrot.slane %v616_v2, 1  ;;  %v649_v14 = vrot.slane %v648_v3, 4  ;;  %v642_v16 = vrot.slane %v641_v7, 2 }
 0x2fc   : > { %v655_v18 = vsel %vm369_vm0, %v604_v10, 0.0  ;;  %v674_v50 = vsel %vm369_vm0, %v609_v33, 0.0 }
 0x2fd   : > { %v712_v21 = vmul.f32 %v1583_v41, %v700_v12  ;;  %v618_v22 = vadd.f32 %v617_v13, %v616_v2  ;;  %v650_v23 = vadd.f32 %v649_v14, %v648_v3  ;;  %v578_v24 = vpop.permute.xlu1 %577  ;;  %v643_v25 = vadd.f32 %v642_v16, %v641_v7 }
 0x2fe   : > { %v657_v27 = vadd.f32 %v656_v15, %v655_v18  ;;  %v606_v29 = vmul.f32 %v578_v24, %v1559_v61  ;;  %v792_v34 = vrot.slane %v700_v12, 6 }
 0x2ff   : > { %v698_v31 = vadd.f32 %v618_v22, %v1530_v5  ;;  %v651_v32 = vrot.slane %v650_v23, 2  ;;  %v644_v35 = vrot.slane %v643_v25, 1  ;;  %v741_v38 = vadd.f32 %v725_v46, %v712_v21 }
 0x300   : > { %v658_v36 = vrot.slane %v657_v27, 4  ;;  %v664_v37 = vsel %vm369_vm0, %v606_v29, 0.0 }
 0x301   : > { %v710_v39 = vmul.f32 %v1583_v41, %v698_v31  ;;  %v791_v40 = vsel %vm400_vm4, %v790_v20, %v698_v31  ;;  %v652_v42 = vadd.f32 %v651_v32, %v650_v23  ;;  %v589_v43 = vpop.permute.xlu1 %588  ;;  %v645_v44 = vadd.f32 %v644_v35, %v643_v25 }
 0x302   : > { %v659_v45 = vadd.f32 %v658_v36, %v657_v27  ;;  %v666_v47 = vadd.f32 %v665_v26, %v664_v37  ;;  %v608_v48 = vmul.f32 %v589_v43, %v1559_v61  ;;  %v793_v52 = vsel %vm401_vm5, %v792_v34, %v791_v40 }
 0x303   : > { %v739_v49 = vadd.f32 %v1575_v28, %v710_v39  ;;  %v653_v62 = vrot.slane %v652_v42, 1  ;;  %v701_v46 = vadd.f32 %v685_v51, %v645_v44  ;;  %v757_v56 = vrot.slane %v741_v38, 6 }
 0x304   : > { %v660_v53 = vrot.slane %v659_v45, 2  ;;  %v667_v54 = vrot.slane %v666_v47, 4  ;;  %v673_v55 = vsel %vm369_vm0, %v608_v48, 0.0  ;;  %v730_v40 = vrot.slane %v1575_v28, 7 }
 0x305   : > { %v654_v57 = vadd.f32 %v653_v62, %v652_v42  ;;  %v675_v59 = vadd.f32 %v674_v50, %v673_v55  ;;  %v756_v60 = vsel %vm400_vm4, %v755_v30, %v739_v49  ;;  %v713_v61 = vmul.f32 %v1583_v41, %v701_v46 }
 0x306   : > { %v794_v63 = vrot.slane %v701_v46, 5  ;;  %v661_v0 = vadd.f32 %v660_v53, %v659_v45  ;;  %v668_v1 = vadd.f32 %v667_v54, %v666_v47  ;;  %v758_v51 = vsel %vm401_vm5, %v757_v56, %v756_v60 }
 0x307   : > { %v702_v2 = vadd.f32 %v686_v58, %v654_v57  ;;  %v676_v3 = vrot.slane %v675_v59, 4  ;;  %v742_v8 = vadd.f32 %v726_v6, %v713_v61  ;;  %v688_v58 = vrot.slane %v1530_v5, 6 }
 0x308   : > { %v662_v4 = vrot.slane %v661_v0, 1  ;;  %v669_v7 = vrot.slane %v668_v1, 2  ;;  %v795_v10 = vsel %vm403_vm6, %v794_v63, %v793_v52  ;;  %v728_v6 = vrot.slane %v1575_v28, 5 }
 0x309   : > { %v714_v11 = vmul.f32 %v1583_v41, %v702_v2  ;;  %v796_v12 = vrot.slane %v702_v2, 4  ;;  %v677_v13 = vadd.f32 %v676_v3, %v675_v59  ;;  %v759_v16 = vrot.slane %v742_v8, 5 }
 0x30a   : > { %v663_v14 = vadd.f32 %v662_v4, %v661_v0  ;;  %v670_v15 = vadd.f32 %v669_v7, %v668_v1 }
 0x30b   : > { %v678_v17 = vrot.slane %v677_v13, 2  ;;  %v743_v18 = vadd.f32 %v727_v19, %v714_v11  ;;  %v797_v20 = vsel %vm405_vm7, %v796_v12, %v795_v10  ;;  %v760_v23 = vsel %vm403_vm6, %v759_v16, %v758_v51 }
 0x30c   : > { %v703_v21 = vadd.f32 %v687_v9, %v663_v14  ;;  %v671_v22 = vrot.slane %v670_v15, 1  ;;  %v689_v19 = vrot.slane %v1530_v5, 7  ;;  %v729_v9 = vrot.slane %v1575_v28, 6 }
 0x30d   : > { %v679_v24 = vadd.f32 %v678_v17, %v677_v13  ;;  %v761_v25 = vrot.slane %v743_v18, 4  ;;  %v774_v28 = vstv %s773_s17 }
 0x30e   : > { %v798_v26 = vrot.slane %v703_v21, 3  ;;  %v672_v27 = vadd.f32 %v671_v22, %v670_v15  ;;  %v715_v29 = vmul.f32 %v1583_v41, %v703_v21 }
 0x30f   : > { %v680_v30 = vrot.slane %v679_v24, 1  ;;  %v762_v31 = vsel %vm405_vm7, %v761_v25, %v760_v23 }
 0x310   : > { %v704_v32 = vadd.f32 %v688_v58, %v672_v27  ;;  %v744_v33 = vadd.f32 %v728_v6, %v715_v29  ;;  %v799_v34 = vsel %vm407_vm8, %v798_v26, %v797_v20 }
 0x311   : > { %v681_v35 = vadd.f32 %v680_v30, %v679_v24 }
 0x312   : > { %v716_v36 = vmul.f32 %v1583_v41, %v704_v32  ;;  %v763_v37 = vrot.slane %v744_v33, 3  ;;  %v800_v38 = vrot.slane %v704_v32, 2 }
 0x313   : > { %v705_v39 = vadd.f32 %v689_v19, %v681_v35 }
 0x314   : > { %v745_v42 = vadd.f32 %v729_v9, %v716_v36  ;;  %v764_v43 = vsel %vm407_vm8, %v763_v37, %v762_v31  ;;  %v801_v44 = vsel %vm409_vm9, %v800_v38, %v799_v34 }
 0x315   : > { %v717_v45 = vmul.f32 %v1583_v41, %v705_v39  ;;  %v802_v47 = vrot.slane %v705_v39, 1 }
 0x316   : > { %v765_v48 = vrot.slane %v745_v42, 2 }
 0x317   : > { %v746_v49 = vadd.f32 %v730_v40, %v717_v45  ;;  %v803_v62 = vsel %vm411_vm10, %v802_v47, %v801_v44 }
 0x318   : > { %v766_v50 = vsel %vm409_vm9, %v765_v48, %v764_v43 }
 0x319   : > { %v767_v52 = vrot.slane %v746_v49, 1 }
 0x31b   : > { %v768_v46 = vsel %vm411_vm10, %v767_v52, %v766_v50 }
 0x31c   : > { %v770_v53 = vsel %vm369_vm0, %v768_v46, 0.0 }
 0x31d   : > { %771 = vadd.xlane.f32.xlu1 %v770_v53 }
 0x3aa   : > { %v772_v54 = vpop.xlane.xlu1 %771 }
 0x3ab   : > { %v775_v55 = vadd.f32 %v774_v28, %v772_v54 }
 0x3ad   : > { %v969_v56 = vmul.f32 -1.442695, %v775_v55 }
 0x3af   : > { %1065 = vpow2.f32 %v969_v56 }
 0x3b9   : > { %v1066_v41 = vpop.eup %1065 }
 0x3ba   : > { %v779_v57 = vadd.f32 1.0, %v1066_v41 }
 0x3bc   : > { %1067 = vrcp.f32 %v779_v57 }
 0x3c6   : > { %v1068_v59 = vpop.eup %1067 }
 0x3c7   : > { %v806_v60 = vsub.f32 1.0, %v1068_v59  ;;  %v805_v61 = vmul.f32 %v1068_v59, %v803_v62 }
 0x3c9   : > { %v807_v63 = vmul.f32 %v806_v60, %v1530_v5 }
 0x3cb   : > { %v808_v0 = vadd.f32 %v807_v63, %v805_v61 }
 0x3cd   : > { %809 = vst.msk [vmem:[%s351_s28] sm:$0xff] %vm369_vm0, %v808_v0 }
 0x3ce   : > { %1200 = shalt.err (!%p1197_p4)
}
 0x3cf   : > { %s1201_s18 = scalar_lea.hbm %s1654_s29, 128  ;;  %s1205_s27 = scalar_lea.hbm %s1704_s6, 512 }
 0x3d0   : > { %p1202_p2 = scmp.ne.s32.totalorder %s1654_s29, %s1201_s18  ;;  %p1206_p6 = scmp.lt.u32.totalorder %s1654_s29, %s1704_s6 }
 0x3d1   : > { %p1207_p1 = scmp.lt.u32.totalorder %s1205_s27, %s1201_s18  ;;  %p1209_p3 = scmp.lt.u32.totalorder %s1201_s18, %s1654_s29 }
 0x3d2   : > { %p1203_p13 = pnand %p1202_p2, %p1737_p8 }
 0x3d3   : > { %p1208_p0 = por %p1207_p1, %p1206_p6 }
 0x3d4   : > { %p1204_p10 = pneg %p1203_p13 }
 0x3d5   : > { %p1210_p11 = por %p1209_p3, %p1208_p0 }
 0x3d7   : > { %p1211_p9 = pnand %p1210_p11, %p1204_p10 }
 0x3d9   : > { %1214 = shalt.err (!%p1211_p9)
}
 0x3da   : > { %996 = dma.vmem_to_hbm [thread:$0]  (%p1737_p8), %s1656_s30, 128, %s1654_s29, %s811_s14  }
 0x3db PF: > { %p1019_p12 = scmp.ge.s32.totalorder %s1261_s26, 2  ;;  %s836_s11 = sand.u32 1, %s1249_s23  }
 0x3dc   : > { %p1738_p5 = scmp.ne.s32.totalorder %s1727_s15, 0  ;;  %s837_s22 = scalar_lea.sflag [#allocation5], %s836_s11 }
 0x3de   : > { %p1013_p7 = pnand %p1019_p12, %p1738_p5 }
 0x3e0   : > { %1244 = dma.done.wait (!%p1013_p7), %s837_s22, 128  }
 0x3e1   : > { %1246 = vsyncadd (!%p1013_p7), %s837_s22, 4294967168  ;;  %s1739_s26 = sld [smem:[#allocation17_spill]]  ;;  %s1740_s8 = sld [smem:[#allocation16_spill]] }
 0x3e2   : > { %s1741_s25 = sld [smem:[#allocation18_spill]]  ;;  %s1742_s23 = smov %s1253_s24 }
 0x3e7   : > { %p24_p4 = scmp.ge.s32.totalorder %s1739_s26, 6   ;;  %s1743_s24 = smov %s1740_s8 }
 0x3e9   :  { %26 = sbr.rel (!%p24_p4) target bundleno = 11 (0xb), region = 117 }
 0x3f0   :  { %842 = vsyncpa [#allocation4], 1 }
 0x3f1   :  { %844 = vsyncpa [#allocation4 + $0x1], 1 }
 0x3f2   :  { %845 = vsyncpa [#allocation7], 1 }
 0x3f3   :  { %847 = vsyncpa [#allocation7 + $0x1], 1 }
 0x3f4   :  { %848 = vsyncpa [#allocation10], 1 }
 0x3f5   :  { %849 = vsyncpa [#allocation5], 1 }
 0x3f6   :  { %851 = vsyncpa [#allocation5 + $0x1], 1 }

</bundles_post_ra>
